<compile_context>
chip_gen: v6e
topology: v6e:2x2x1
jax: 0.10.0
libtpu: 0.0.40
codegen_flags: <defaults>
</compile_context>

<pallas_src>
import functools

import numpy as np
import jax
import jax.numpy as jnp
from jax.experimental import pallas as pl
from jax.experimental.pallas import tpu as pltpu

_LANES = 128
_RESEED = 3  # direct sin/cos every 3rd band; recurrence in between


def _cdiv(a: int, b: int) -> int:
    return -(-a // b)


def _round_up(a: int, b: int) -> int:
    return _cdiv(a, b) * b


def _make_freq_bands(num_freqs: int, log_space: bool):
    """Static (trace-time) frequency bands, identical to the torch module."""
    if log_space:
        bands = 2.0 ** np.linspace(0.0, num_freqs - 1, num_freqs)
    else:
        bands = np.linspace(2.0 ** 0.0, 2.0 ** (num_freqs - 1), num_freqs)
    return tuple(float(f) for f in bands)


def _pe_kernel(xT_ref, o_ref, stack_ref, *, freq_bands, log_space, reseed):
    # xT_ref:    (d, T)        transposed input tile (points on lanes -> lane-dense)
    # o_ref:     (rows, C*d)   final interleaved output tile (rows <= T)
    # stack_ref: (Cd_pad, T)   f32 scratch: row c*d + j holds chunk c of input dim j
    d = xT_ref.shape[0]
    n_freqs = len(freq_bands)
    cd = (1 + 2 * n_freqs) * d
    cd_pad = stack_ref.shape[0]
    t_cols = stack_ref.shape[1]

    x = xT_ref[...].astype(jnp.float32)      # f32 transcendentals (v5e-safe)
    stack_ref[0:d, :] = x                    # identity chunk
    if cd_pad > cd:                          # keep (discarded) pad rows defined
        stack_ref[cd:cd_pad, :] = jnp.zeros((cd_pad - cd, t_cols), jnp.float32)

    if n_freqs > 0:
        if (not log_space) and n_freqs >= 2:
            # Linear spacing: constant band step -> angle-addition recurrence.
            step = freq_bands[1] - freq_bands[0]
            sin_step = jnp.sin(x * step)
            cos_step = jnp.cos(x * step)
        s = c = None
        for k, f in enumerate(freq_bands):
            if k % reseed == 0:
                # Direct evaluation (reseed) — bounds recurrence error growth.
                a = x if f == 1.0 else x * f
                s, c = jnp.sin(a), jnp.cos(a)
            elif log_space:
                # f_k = 2 * f_{k-1}: double-angle identities (VPU FMAs only).
                s, c = 2.0 * s * c, 1.0 - 2.0 * s * s
            else:
                # f_k = f_{k-1} + step: angle-addition identities.
                s, c = s * cos_step + c * sin_step, c * cos_step - s * sin_step
            stack_ref[(1 + 2 * k) * d:(2 + 2 * k) * d, :] = s
            stack_ref[(2 + 2 * k) * d:(3 + 2 * k) * d, :] = c

    # Single in-VMEM transpose (XLU) turns the chunk stack into the interleaved
    # layout; slice off lane/row padding and store the final block directly.
    interleaved = stack_ref[...].T                        # (T, Cd_pad)
    rows = o_ref.shape[0]
    o_ref[...] = interleaved[:rows, :cd].astype(o_ref.dtype)


@functools.partial(
    jax.jit, static_argnames=("freq_bands", "log_space", "max_tile_points")
)
def _positional_encode(x, *, freq_bands, log_space, max_tile_points):
    d = x.shape[-1]
    n_freqs = len(freq_bands)
    cd = (1 + 2 * n_freqs) * d
    cd_pad = _round_up(max(cd, 8), 8)
    lead_shape = x.shape[:-1]
    n = 1
    for s_ in lead_shape:
        n *= s_
    itemsize = jnp.dtype(x.dtype).itemsize

    # (n, d) -> (d, n): small relayout (input is C-times smaller than output)
    # so the kernel's compute and stores are lane-dense along points.
    xT = jnp.transpose(x.reshape(n, d))

    # Per-point VMEM bytes: double-buffered out block, f32 scratch + transposed
    # temp, live per-band pieces, double-buffered input block.
    per_point = (2 * cd * itemsize + 2 * cd_pad * 4 + 8 * d * 4
                 + 2 * d * itemsize + 64)
    budget = 12 << 20
    cap = max(_LANES, min(16384, (budget // per_point) // _LANES * _LANES))
    if max_tile_points is not None:
        cap = max(_LANES, min(cap, (max_tile_points // _LANES) * _LANES))

    if n <= cap:
        # Single maximal tile (no per-step overhead, no output raggedness).
        grid_n = 1
        in_tile = _round_up(n, _LANES)
        out_rows = n
    else:
        # Balanced tiles; even grid so both v7x TensorCores get equal work
        # (harmless ~0.35us/step on single-TC v5e/v6e).
        grid_n = _cdiv(n, cap)
        if grid_n % 2:
            grid_n += 1
        in_tile = _round_up(_cdiv(n, grid_n), _LANES)
        grid_n = _cdiv(n, in_tile)      # drop blocks made empty by rounding
        out_rows = in_tile              # last output block is ragged -> clipped

    n_pad = grid_n * in_tile
    if n_pad != n:
        # Cheap input-side pad only (zeros); padded columns never reach HBM.
        xT = jnp.pad(xT, ((0, 0), (0, n_pad - n)))

    kernel = functools.partial(
        _pe_kernel, freq_bands=freq_bands, log_space=log_space, reseed=_RESEED
    )
    out = pl.pallas_call(
        kernel,
        out_shape=jax.ShapeDtypeStruct((n, cd), x.dtype),
        grid=(grid_n,),
        in_specs=[pl.BlockSpec((d, in_tile), lambda i: (0, i))],
        out_specs=pl.BlockSpec((out_rows, cd), lambda i: (i, 0)),
        scratch_shapes=[pltpu.VMEM((cd_pad, in_tile), jnp.float32)],
        compiler_params=pltpu.CompilerParams(
            dimension_semantics=("parallel",),
            vmem_limit_bytes=32 << 20,
        ),
    )(xT)
    return out.reshape(*lead_shape, cd)


class PositionalEncoderPallas:
    """Pallas-TPU equivalent of kornia.nerf.positional_encoder.PositionalEncoder."""

    def __init__(self, num_dims: int, num_freqs: int, log_space: bool = False,
                 *, max_tile_points=None):
        self._num_dims = num_dims
        self._num_freqs = num_freqs
        self._log_space = bool(log_space)
        self._freq_bands = _make_freq_bands(num_freqs, log_space)
        self._max_tile_points = max_tile_points  # testing knob: forces multi-block path
        self._num_encoded_dims = num_dims * (1 + 2 * num_freqs)

    @property
    def num_encoded_dims(self) -> int:
        return self._num_encoded_dims

    def __call__(self, x: jax.Array) -> jax.Array:
        if x.ndim < 1:
            raise ValueError("Input tensor represents a scalar")
        if x.shape[-1] != self._num_dims:
            raise ValueError(
                f"Input tensor number of dimensions {x.shape[-1]} does not match "
                f"instantiated dimensionality {self._num_dims}"
            )
        return _positional_encode(
            x,
            freq_bands=self._freq_bands,
            log_space=self._log_space,
            max_tile_points=self._max_tile_points,
        )


def _reference(x, num_freqs, log_space=False):
    """Pure-JAX reference mirroring the torch module."""
    bands = _make_freq_bands(num_freqs, log_space)
    chunks = [x]
    for f in bands:
        chunks.append(jnp.sin(x * f))
        chunks.append(jnp.cos(x * f))
    return jnp.concatenate(chunks, axis=-1)


if __name__ == "__main__":
    key = jax.random.PRNGKey(0)
    k1, k2, k3 = jax.random.split(key, 3)

    # Case 1: small NeRF-like shape, linear frequency spacing.
    num_dims, num_freqs = 4, 3
    x = jax.random.normal(k1, (2, 64, num_dims), dtype=jnp.float32)
    enc = PositionalEncoderPallas(num_dims, num_freqs, log_space=False)
    out = jax.block_until_ready(enc(x))
    ref = _reference(x, num_freqs, log_space=False)
    assert out.shape == (2, 64, enc.num_encoded_dims), out.shape
    assert jnp.allclose(out, ref, atol=1e-5, rtol=1e-5), "case 1 mismatch"

    # Case 2: log-spaced frequencies, same data.
    enc_log = PositionalEncoderPallas(num_dims, num_freqs, log_space=True)
    out_log = jax.block_until_ready(enc_log(x))
    ref_log = _reference(x, num_freqs, log_space=True)
    assert jnp.allclose(out_log, ref_log, atol=1e-5, rtol=1e-5), "case 2 mismatch"

    # Case 3: odd leading shape, d=3, F=10 (bands up to 512; exercises the
    # reseeded recurrence).  Tolerance is loosened slightly because both the
    # recurrence and the reference's own large-argument range reduction carry
    # O(1e-4)-level f32 error at the highest bands.
    x3 = jax.random.uniform(k2, (5, 7, 3), jnp.float32, minval=-1.0, maxval=1.0)
    enc3 = PositionalEncoderPallas(3, 10, log_space=True)
    out3 = jax.block_until_ready(enc3(x3))
    ref3 = _reference(x3, 10, log_space=True)
    assert out3.shape == (5, 7, enc3.num_encoded_dims), out3.shape
    assert jnp.allclose(out3, ref3, atol=2e-4, rtol=2e-4), "case 3 mismatch"

    # Case 4: force the multi-block path (balanced tiles, even grid, ragged
    # last output block) at a small size via the testing knob.
    x4 = jax.random.normal(k3, (1000, 4), dtype=jnp.float32)
    enc4 = PositionalEncoderPallas(4, 5, log_space=True, max_tile_points=256)
    out4 = jax.block_until_ready(enc4(x4))
    ref4 = _reference(x4, 5, log_space=True)
    assert out4.shape == (1000, enc4.num_encoded_dims), out4.shape
    assert jnp.allclose(out4, ref4, atol=5e-5, rtol=5e-5), "case 4 mismatch"

    print("KERNEL_OK")
</pallas_src>

<mosaic_0001>
module attributes {stable_mosaic.version = 11 : i64} {
  func.func @_pe_kernel(%arg0: i32, %arg1: memref<4x128xf32, #tpu.memory_space<vmem>>, %arg2: memref<128x28xf32, #tpu.memory_space<vmem>>, %arg3: memref<32x128xf32, #tpu.memory_space<vmem>>) attributes {dimension_semantics = [#tpu.dimension_semantics<parallel>], iteration_bounds = array<i64: 1>, scalar_prefetch = 0 : i64, scratch_operands = 1 : i64, tpu.core_type = #tpu.core_type<tc>, window_params = [{transform_indices = @transform_0, window_bounds = array<i64: 4, 128>}, {transform_indices = @transform_1, window_bounds = array<i64: 128, 28>}]} {
    %c0 = arith.constant 0 : index
    %c0_0 = arith.constant 0 : index
    %0 = vector.load %arg1[%c0, %c0_0] : memref<4x128xf32, #tpu.memory_space<vmem>>, vector<4x128xf32>
    %c0_1 = arith.constant 0 : index
    %c0_2 = arith.constant 0 : index
    %1 = vector.load %arg3[%c0_1, %c0_2] : memref<32x128xf32, #tpu.memory_space<vmem>>, vector<4x128xf32>
    tpu.vector_store %arg3[%c0_1, %c0_2], %0 {strides = array<i32>} : memref<32x128xf32, #tpu.memory_space<vmem>>, vector<4x128xf32>,
    %cst = arith.constant 0.000000e+00 : f32
    %2 = vector.broadcast %cst : f32 to vector<4x128xf32>
    %c28 = arith.constant 28 : index
    %c0_3 = arith.constant 0 : index
    %3 = vector.load %arg3[%c28, %c0_3] : memref<32x128xf32, #tpu.memory_space<vmem>>, vector<4x128xf32>
    tpu.vector_store %arg3[%c28, %c0_3], %2 {strides = array<i32>} : memref<32x128xf32, #tpu.memory_space<vmem>>, vector<4x128xf32>,
    %cst_4 = arith.constant 1.500000e+00 : f32
    %4 = vector.broadcast %cst_4 : f32 to vector<4x128xf32>
    %5 = arith.mulf %0, %4 : vector<4x128xf32>
    %6 = math.sin %5 : vector<4x128xf32>
    %cst_5 = arith.constant 1.500000e+00 : f32
    %7 = vector.broadcast %cst_5 : f32 to vector<4x128xf32>
    %8 = arith.mulf %0, %7 : vector<4x128xf32>
    %9 = math.cos %8 : vector<4x128xf32>
    %10 = math.sin %0 : vector<4x128xf32>
    %11 = math.cos %0 : vector<4x128xf32>
    %c4 = arith.constant 4 : index
    %c0_6 = arith.constant 0 : index
    %12 = vector.load %arg3[%c4, %c0_6] : memref<32x128xf32, #tpu.memory_space<vmem>>, vector<4x128xf32>
    tpu.vector_store %arg3[%c4, %c0_6], %10 {strides = array<i32>} : memref<32x128xf32, #tpu.memory_space<vmem>>, vector<4x128xf32>,
    %c8 = arith.constant 8 : index
    %c0_7 = arith.constant 0 : index
    %13 = vector.load %arg3[%c8, %c0_7] : memref<32x128xf32, #tpu.memory_space<vmem>>, vector<4x128xf32>
    tpu.vector_store %arg3[%c8, %c0_7], %11 {strides = array<i32>} : memref<32x128xf32, #tpu.memory_space<vmem>>, vector<4x128xf32>,
    %14 = arith.mulf %10, %9 : vector<4x128xf32>
    %15 = arith.mulf %11, %6 : vector<4x128xf32>
    %16 = arith.addf %14, %15 : vector<4x128xf32>
    %17 = arith.mulf %11, %9 : vector<4x128xf32>
    %18 = arith.mulf %10, %6 : vector<4x128xf32>
    %19 = arith.subf %17, %18 : vector<4x128xf32>
    %c12 = arith.constant 12 : index
    %c0_8 = arith.constant 0 : index
    %20 = vector.load %arg3[%c12, %c0_8] : memref<32x128xf32, #tpu.memory_space<vmem>>, vector<4x128xf32>
    tpu.vector_store %arg3[%c12, %c0_8], %16 {strides = array<i32>} : memref<32x128xf32, #tpu.memory_space<vmem>>, vector<4x128xf32>,
    %c16 = arith.constant 16 : index
    %c0_9 = arith.constant 0 : index
    %21 = vector.load %arg3[%c16, %c0_9] : memref<32x128xf32, #tpu.memory_space<vmem>>, vector<4x128xf32>
    tpu.vector_store %arg3[%c16, %c0_9], %19 {strides = array<i32>} : memref<32x128xf32, #tpu.memory_space<vmem>>, vector<4x128xf32>,
    %22 = arith.mulf %16, %9 : vector<4x128xf32>
    %23 = arith.mulf %19, %6 : vector<4x128xf32>
    %24 = arith.addf %22, %23 : vector<4x128xf32>
    %25 = arith.mulf %19, %9 : vector<4x128xf32>
    %26 = arith.mulf %16, %6 : vector<4x128xf32>
    %27 = arith.subf %25, %26 : vector<4x128xf32>
    %c20 = arith.constant 20 : index
    %c0_10 = arith.constant 0 : index
    %28 = vector.load %arg3[%c20, %c0_10] : memref<32x128xf32, #tpu.memory_space<vmem>>, vector<4x128xf32>
    tpu.vector_store %arg3[%c20, %c0_10], %24 {strides = array<i32>} : memref<32x128xf32, #tpu.memory_space<vmem>>, vector<4x128xf32>,
    %c24 = arith.constant 24 : index
    %c0_11 = arith.constant 0 : index
    %29 = vector.load %arg3[%c24, %c0_11] : memref<32x128xf32, #tpu.memory_space<vmem>>, vector<4x128xf32>
    tpu.vector_store %arg3[%c24, %c0_11], %27 {strides = array<i32>} : memref<32x128xf32, #tpu.memory_space<vmem>>, vector<4x128xf32>,
    %c0_12 = arith.constant 0 : index
    %c0_13 = arith.constant 0 : index
    %30 = vector.load %arg3[%c0_12, %c0_13] : memref<32x128xf32, #tpu.memory_space<vmem>>, vector<32x128xf32>
    %31 = tpu.transpose %30, [1, 0] : vector<32x128xf32> -> vector<128x32xf32>
    %32 = vector.extract_strided_slice %31 {offsets = [0, 0], sizes = [128, 28], strides = [1, 1]} : vector<128x32xf32> to vector<128x28xf32>
    %c0_14 = arith.constant 0 : index
    %c0_15 = arith.constant 0 : index
    %33 = vector.load %arg2[%c0_14, %c0_15] : memref<128x28xf32, #tpu.memory_space<vmem>>, vector<128x28xf32>
    tpu.vector_store %arg2[%c0_14, %c0_15], %32 {strides = array<i32>} : memref<128x28xf32, #tpu.memory_space<vmem>>, vector<128x28xf32>,
    return
  }
  func.func @transform_0(%arg0: i32) -> (i32, i32) {
    %c0_i32 = arith.constant 0 : i32
    %c0_i32_0 = arith.constant 0 : i32
    return %c0_i32, %arg0 : i32, i32
  }
  func.func @transform_1(%arg0: i32) -> (i32, i32) {
    %c0_i32 = arith.constant 0 : i32
    %c0_i32_0 = arith.constant 0 : i32
    return %arg0, %c0_i32 : i32, i32
  }
}

</mosaic_0001>

<bundles_post_ra>
// kernel: _positional_encode.1
= control target key start
LH: loop header
LB: loop body
LE: loop exit
PB: predicated region body
PF: predicated region fallthrough
CT: control target
= control target key end

     0   :  { %v540_v5 = vmov 0.0   ;;  %v541_v25 = vmov 683565275   ;;  %v542_v27 = vmov 2475754826   ;;  %s716_s0 = inlined_call_operand.vmem [shape: f32[4,128], index: 0, kind: input, shape index: {}]   ;;  %s717_s1 = inlined_call_operand.vmem [shape: f32[128,28], index: 1, kind: output, shape index: {}]  }
   0x1   :  { %v560_v0 = vld [vmem:[%s716_s0] sm:$0xf]  ;;  %10 = vst [vmem:[#allocation2 + $0x1c] sm:$0xf] %v540_v5  ;;  %v543_v32 = vmov 2131351028  }
   0x2   :  { %9 = vst [vmem:[#allocation2] sm:$0xf] %v560_v0  ;;  %v564_v1 = vmul.f32 1.5, %v560_v0  ;;  %v222_v2 = vand.u32 2139095040, %v560_v0  ;;  %v219_v9 = vand.u32 2147483647, %v560_v0 }
   0x3   :  { %v544_v34 = vmov 2102212464   ;;  %v545_v36 = vmov 920167782   ;;  %v546_v44 = vmov 1326507024  }
   0x4   :  { %v12_v3 = vand.u32 2147483647, %v564_v1  ;;  %v15_v4 = vand.u32 2139095040, %v564_v1  ;;  %v223_v6 = vshrl.u32 %v222_v2, 23  ;;  %v574_v15 = vand.u32 8388607, %v219_v9 }
   0x5   :  { %vm14_vm14 = vcmp.lt.s32.totalorder %v564_v1, 0 }
   0x6   :  { %v16_v7 = vshrl.u32 %v15_v4, 23  ;;  %v19_v8 = vand.u32 8388607, %v12_v3  ;;  %v509_v10 = vadd.s32 4294967169, %v223_v6  ;;  %v227_v22 = vor.u32 8388608, %v574_v15 }
   0x7   :  { %vm632_vm15 = vcmp.le.f32.partialorder %v12_v3, 0.7853982 }
   0x8   :  { %v501_v11 = vadd.s32 4294967169, %v16_v7  ;;  %v229_v12 = vadd.s32 1, %v509_v10  ;;  %v20_v13 = vor.u32 8388608, %v19_v8 }
   0xa   :  { %v22_v14 = vadd.s32 1, %v501_v11  ;;  %vm230_vm0 = vcmp.gt.s32.totalorder %v229_v12, 0  ;;  %v576_v21 = vshll.u32 %v20_v13, 8 }
   0xb   :  { %v231_v16 = vsel %vm230_vm0, %v229_v12, 0  ;;  %vm221_vm0 = vcmp.lt.s32.totalorder %v560_v0, 0 }
   0xc   :  { %vm23_vm1 = vcmp.gt.s32.totalorder %v22_v14, 0  ;;  %v233_v18 = vand.u32 31, %v231_v16  ;;  %v579_v23 = vshrl.u32 %v231_v16, 5 }
   0xd   :  { %v24_v17 = vsel %vm23_vm1, %v22_v14, 0  ;;  %vm220_vm1 = vcmp.le.f32.partialorder %v219_v9, 0.7853982 }
   0xe   :  { %v25_v19 = vshrl.u32 %v24_v17, 5  ;;  %v26_v20 = vand.u32 31, %v24_v17  ;;  %v234_v24 = vsub.s32 32, %v233_v18  ;;  %v236_v26 = vshll.u32 %v541_v25, %v233_v18 }
   0xf   :  { %v239_v28 = vshll.u32 %v542_v27, %v233_v18  ;;  %v242_v38 = vshll.u32 %v543_v32, %v233_v18  ;;  %v245_v14 = vshll.u32 %v544_v34, %v233_v18  ;;  %v248_v16 = vshll.u32 %v545_v36, %v233_v18 }
  0x10   :  { %v27_v29 = vsub.s32 32, %v26_v20  ;;  %v29_v30 = vshll.u32 %v541_v25, %v26_v20  ;;  %v32_v31 = vshll.u32 %v542_v27, %v26_v20  ;;  %v35_v33 = vshll.u32 %v543_v32, %v26_v20 }
  0x11   :  { %v38_v35 = vshll.u32 %v544_v34, %v26_v20  ;;  %v41_v37 = vshll.u32 %v545_v36, %v26_v20  ;;  %vm44_vm2 = vcmp.lt.s32.totalorder %v25_v19, 1  ;;  %vm45_vm3 = vcmp.lt.s32.totalorder %v25_v19, 2 }
  0x12   :  { %v28_v39 = vshrl.u32 %v541_v25, %v27_v29  ;;  %v30_v40 = vshrl.u32 %v542_v27, %v27_v29  ;;  %v33_v41 = vshrl.u32 %v543_v32, %v27_v29  ;;  %v36_v42 = vshrl.u32 %v544_v34, %v27_v29 }
  0x13   :  { %v39_v43 = vshrl.u32 %v545_v36, %v27_v29  ;;  %v42_v45 = vshrl.u32 %v546_v44, %v27_v29  ;;  %vm46_vm4 = vcmp.lt.s32.totalorder %v25_v19, 3  ;;  %vm47_vm5 = vcmp.lt.s32.totalorder %v25_v19, 4 }
  0x14   :  { %v31_v46 = vor.u32 %v30_v40, %v29_v30  ;;  %v34_v47 = vor.u32 %v33_v41, %v32_v31  ;;  %v37_v48 = vor.u32 %v36_v42, %v35_v33  ;;  %v237_v51 = vshrl.u32 %v542_v27, %v234_v24 }
  0x15   :  { %v40_v49 = vor.u32 %v39_v43, %v38_v35  ;;  %v43_v50 = vor.u32 %v42_v45, %v41_v37  ;;  %v240_v52 = vshrl.u32 %v543_v32, %v234_v24  ;;  %v235_v60 = vshrl.u32 %v541_v25, %v234_v24 }
  0x16   :  { %v48_v53 = vsel %vm44_vm2, %v28_v39, %v31_v46  ;;  %v49_v54 = vsel %vm47_vm5, %v37_v48, 2102212464  ;;  %v52_v55 = vsel %vm44_vm2, %v31_v46, %v34_v47  ;;  %v56_v56 = vsel %vm44_vm2, %v34_v47, %v37_v48 }
  0x17   :  { %v50_v57 = vsel %vm46_vm4, %v34_v47, %v49_v54  ;;  %v53_v58 = vsel %vm47_vm5, %v40_v49, 920167782  ;;  %v57_v59 = vsel %vm47_vm5, %v43_v50, 1326507024  ;;  %v238_v2 = vor.u32 %v237_v51, %v236_v26 }
  0x18   :  { %v51_v61 = vsel %vm45_vm3, %v48_v53, %v50_v57  ;;  %v54_v62 = vsel %vm46_vm4, %v37_v48, %v53_v58  ;;  %v58_v63 = vsel %vm46_vm4, %v40_v49, %v57_v59  ;;  %v241_v6 = vor.u32 %v240_v52, %v239_v28 }
  0x19   :  { %v55_v4 = vsel %vm45_vm3, %v52_v55, %v54_v62  ;;  %v59_v5 = vsel %vm45_vm3, %v56_v56, %v58_v63  ;;  %v243_v7 = vshrl.u32 %v544_v34, %v234_v24  ;;  %v246_v15 = vshrl.u32 %v545_v36, %v234_v24 }
  0x1a   :  { %v591_v8 = vmul.u32.u64.low %v576_v21, %v59_v5  ;;  %v592_v10 = vmul.u32.u64.high %v576_v21, %v59_v5, %v591_v8  ;;  %v595_v11 = vmul.u32.u64.low %v576_v21, %v55_v4  ;;  %v596_v12 = vmul.u32.u64.high %v576_v21, %v55_v4, %v595_v11 }
  0x1b   :  { %v244_v13 = vor.u32 %v243_v7, %v242_v38  ;;  %v67_v17 = vmul.u32 %v576_v21, %v51_v61  ;;  %v249_v20 = vshrl.u32 %v546_v44, %v234_v24  ;;  %vm251_vm6 = vcmp.lt.s32.totalorder %v579_v23, 1 }
  0x1c   :  { %v267_v19 = vshll.u32 %v227_v22, 8  ;;  %v247_v25 = vor.u32 %v246_v15, %v245_v14  ;;  %vm252_vm7 = vcmp.lt.s32.totalorder %v579_v23, 2  ;;  %vm253_vm8 = vcmp.lt.s32.totalorder %v579_v23, 3 }
  0x1d   :  { %vm254_vm9 = vcmp.lt.s32.totalorder %v579_v23, 4  ;;  %vm69_vm10 = vc.u32 %v592_v10, %v595_v11  ;;  %v70_v26 = vadd.s32 1, %v596_v12  ;;  %v250_v27 = vor.u32 %v249_v20, %v248_v16 }
  0x1e   :  { %v259_v28 = vsel %vm251_vm6, %v238_v2, %v241_v6  ;;  %v255_v18 = vsel %vm251_vm6, %v235_v60, %v238_v2  ;;  %v256_v29 = vsel %vm254_vm9, %v244_v13, 2102212464  ;;  %v260_v21 = vsel %vm254_vm9, %v247_v25, 920167782 }
  0x1f   :  { %v263_v24 = vsel %vm251_vm6, %v241_v6, %v244_v13  ;;  %v71_v30 = vsel %vm69_vm10, %v70_v26, %v596_v12  ;;  %v257_v22 = vsel %vm253_vm8, %v241_v6, %v256_v29  ;;  %v261_v31 = vsel %vm253_vm8, %v244_v13, %v260_v21 }
  0x20   :  { %v264_v32 = vsel %vm254_vm9, %v250_v27, 1326507024  ;;  %v72_v33 = vadd.s32 %v71_v30, %v67_v17  ;;  %v262_v34 = vsel %vm252_vm7, %v259_v28, %v261_v31  ;;  %v258_v36 = vsel %vm252_vm7, %v255_v18, %v257_v22 }
  0x21   :  { %v265_v35 = vsel %vm253_vm8, %v247_v25, %v264_v32  ;;  %v618_v38 = vmul.u32.u64.low %v267_v19, %v262_v34  ;;  %v619_v39 = vmul.u32.u64.high %v267_v19, %v262_v34, %v618_v38  ;;  %v274_v44 = vmul.u32 %v267_v19, %v258_v36 }
  0x22   :  { %v266_v37 = vsel %vm252_vm7, %v263_v24, %v265_v35  ;;  %v73_v40 = vadd.s32 536870912, %v72_v33  ;;  %v68_v57 = vadd.s32 %v595_v11, %v592_v10  ;;  %vm104_vm8 = vweird.f32 %v564_v1 }
  0x23   :  { %v621_v41 = vmul.u32.u64.low %v267_v19, %v266_v37  ;;  %v622_v42 = vmul.u32.u64.high %v267_v19, %v266_v37, %v621_v41  ;;  %v277_v45 = vadd.s32 1, %v619_v39 }
  0x24   :  { %v74_v43 = vshrl.u32 %v73_v40, 30 }
  0x25   :  { %vm276_vm11 = vc.u32 %v622_v42, %v618_v38  ;;  %v275_v14 = vadd.s32 %v618_v38, %v622_v42 }
  0x26   :  { %v75_v46 = vshll.u32 %v74_v43, 30  ;;  %v278_v47 = vsel %vm276_vm11, %v277_v45, %v619_v39  ;;  %v98_v21 = vsub.s32 4, %v74_v43 }
  0x27   :  { %v279_v49 = vadd.s32 %v278_v47, %v274_v44 }
  0x28   :  { %v76_v48 = vsub.s32 %v72_v33, %v75_v46  ;;  %v99_v32 = vsel %vm14_vm14, %v98_v21, %v74_v43 }
  0x29   :  { %v280_v50 = vadd.s32 536870912, %v279_v49  ;;  %v101_v35 = vsel %vm632_vm15, 0, %v99_v32 }
  0x2a   :  { %v78_v23 = vsub.s32 0, %v76_v48  ;;  %v105_v39 = vadd.s32 3, %v101_v35  ;;  %v209_v43 = vand.u32 3, %v101_v35 }
  0x2b   :  { %v281_v52 = vshrl.u32 %v280_v50, 30 }
  0x2c   :  { %v502_v51 = vmin.u32 %v78_v23, %v76_v48  ;;  %v106_v42 = vand.u32 3, %v105_v39  ;;  %vm211_vm4 = vcmp.eq.s32.totalorder %v209_v43, 0  ;;  %vm214_vm5 = vcmp.eq.s32.totalorder %v209_v43, 2 }
  0x2d   :  { %v282_v54 = vshll.u32 %v281_v52, 30  ;;  %v305_v3 = vsub.s32 4, %v281_v52  ;;  %vm210_vm7 = vcmp.lt.s32.totalorder %v209_v43, 2 }
  0x2e   :  { %v80_v53 = vclz %v502_v51  ;;  %vm108_vm2 = vcmp.eq.s32.totalorder %v106_v42, 0  ;;  %vm111_vm3 = vcmp.eq.s32.totalorder %v106_v42, 2  ;;  %vm107_vm6 = vcmp.lt.s32.totalorder %v106_v42, 2 }
  0x2f   :  { %v283_v56 = vsub.s32 %v279_v49, %v282_v54  ;;  %v306_v37 = vsel %vm221_vm0, %v305_v3, %v281_v52 }
  0x30   :  { %v503_v55 = vadd.s32 4294967294, %v80_v53  ;;  %v308_v40 = vsel %vm220_vm1, 0, %v306_v37 }
  0x31   :  { %v285_v59 = vsub.s32 0, %v283_v56  ;;  %v312_v45 = vadd.s32 3, %v308_v40 }
  0x32   :  { %vm504_vm12 = vcmp.lt.s32.totalorder %v503_v55, 0 }
  0x33   :  { %v83_v58 = vsel %vm504_vm12, 0, %v503_v55  ;;  %v510_v63 = vmin.u32 %v285_v59, %v283_v56  ;;  %v313_v9 = vand.u32 3, %v312_v45 }
  0x34   :  { %v84_v60 = vsub.s32 32, %v83_v58  ;;  %v85_v61 = vshll.u32 %v76_v48, %v83_v58  ;;  %v88_v62 = vsub.s32 4294967266, %v83_v58  ;;  %v416_v48 = vand.u32 3, %v308_v40 }
  0x35   :  { %v287_v5 = vclz %v510_v63  ;;  %vm318_vm9 = vcmp.eq.s32.totalorder %v313_v9, 2  ;;  %vm315_vm12 = vcmp.eq.s32.totalorder %v313_v9, 0 }
  0x36   :  { %v86_v2 = vshrl.u32 %v68_v57, %v84_v60  ;;  %v89_v4 = vadd.s32 127, %v88_v62  ;;  %vm418_vm10 = vcmp.eq.s32.totalorder %v416_v48, 0  ;;  %vm421_vm11 = vcmp.eq.s32.totalorder %v416_v48, 2 }
  0x37   :  { %v511_v8 = vadd.s32 4294967294, %v287_v5 }
  0x38   :  { %v87_v6 = vor.u32 %v86_v2, %v85_v61  ;;  %v90_v7 = vshll.u32 %v89_v4, 23 }
  0x39   :  { %vm512_vm13 = vcmp.lt.s32.totalorder %v511_v8, 0 }
  0x3a   :  { %v91_v12 = vor.u32 4788187, %v90_v7  ;;  %v94_v13 = vcvt.s32.f32 %v87_v6  ;;  %v290_v10 = vsel %vm512_vm13, 0, %v511_v8  ;;  %vm314_vm13 = vcmp.lt.s32.totalorder %v313_v9, 2 }
  0x3b   :  { %v291_v11 = vsub.s32 32, %v290_v10  ;;  %v292_v16 = vshll.u32 %v283_v56, %v290_v10  ;;  %v295_v17 = vsub.s32 4294967266, %v290_v10 }
  0x3c   :  { %v92_v15 = vand.u32 2147483647, %v91_v12 }
  0x3d   :  { %v293_v19 = vshrl.u32 %v275_v14, %v291_v11  ;;  %v296_v25 = vadd.s32 127, %v295_v17 }
  0x3e   :  { %v95_v20 = vmul.f32 %v94_v13, %v92_v15 }
  0x3f   :  { %v294_v28 = vor.u32 %v293_v19, %v292_v16  ;;  %v297_v18 = vshll.u32 %v296_v25, 23 }
  0x40   :  { %v96_v27 = vxor.u32 2147483648, %v95_v20 }
  0x41   :  { %v298_v30 = vor.u32 4788187, %v297_v18  ;;  %v301_v22 = vcvt.s32.f32 %v294_v28 }
  0x42   :  { %v97_v29 = vsel %vm14_vm14, %v96_v27, %v95_v20  ;;  %vm417_vm14 = vcmp.lt.s32.totalorder %v416_v48, 2 }
  0x43   :  { %v100_v24 = vsel %vm632_vm15, %v564_v1, %v97_v29  ;;  %v299_v31 = vand.u32 2147483647, %v298_v30  ;;  %vm311_vm15 = vweird.f32 %v560_v0 }
  0x44   :  { %532 = vcosq.f32 %v100_v24 }
  0x45   :  { %534 = vsinq.f32 %v100_v24  ;;  %v302_v33 = vmul.f32 %v301_v22, %v299_v31 }
  0x47   :  { %v303_v34 = vxor.u32 2147483648, %v302_v33 }
  0x49   :  { %v304_v36 = vsel %vm221_vm0, %v303_v34, %v302_v33  ;;  %vm480_vm0 = vcmask 228352  }
  0x4a   :  { %v307_v38 = vsel %vm220_vm1, %v560_v0, %v304_v36 }
  0x4b   :  { %536 = vcosq.f32 %v307_v38 }
  0x4c   :  { %538 = vsinq.f32 %v307_v38 }
  0x51   :  { %v533_v41 = vpop.eup %532 }
  0x52   :  { %v535_v44 = vpop.eup %534  ;;  %v112_v47 = vxor.u32 2147483648, %v533_v41 }
  0x53   :  { %v109_v46 = vxor.u32 2147483648, %v535_v44 }
  0x54   :  { %v113_v23 = vsel %vm111_vm3, %v112_v47, %v535_v44  ;;  %v216_v51 = vsel %vm214_vm5, %v112_v47, %v535_v44 }
  0x55   :  { %v110_v49 = vsel %vm108_vm2, %v533_v41, %v109_v46  ;;  %v213_v50 = vsel %vm211_vm4, %v533_v41, %v109_v46 }
  0x56   :  { %v114_v54 = vsel %vm107_vm6, %v110_v49, %v113_v23  ;;  %v217_v55 = vsel %vm210_vm7, %v213_v50, %v216_v51 }
  0x57   :  { %v115_v60 = vsel %vm104_vm8, nan, %v114_v54  ;;  %v218_v61 = vsel %vm104_vm8, nan, %v217_v55 }
  0x58   :  { %v537_v52 = vpop.eup %536 }
  0x59   :  { %v539_v53 = vpop.eup %538  ;;  %v319_v56 = vxor.u32 2147483648, %v537_v52 }
  0x5a   :  { %v316_v57 = vxor.u32 2147483648, %v539_v53 }
  0x5b   :  { %v320_v58 = vsel %vm318_vm9, %v319_v56, %v539_v53  ;;  %v423_v59 = vsel %vm421_vm11, %v319_v56, %v539_v53 }
  0x5c   :  { %v317_v62 = vsel %vm315_vm12, %v537_v52, %v316_v57  ;;  %v420_v63 = vsel %vm418_vm10, %v537_v52, %v316_v57 }
  0x5d   :  { %v321_v2 = vsel %vm314_vm13, %v317_v62, %v320_v58  ;;  %v424_v4 = vsel %vm417_vm14, %v420_v63, %v423_v59 }
  0x5e   :  { %v322_v5 = vsel %vm311_vm15, nan, %v321_v2  ;;  %v425_v6 = vsel %vm311_vm15, nan, %v424_v4 }
  0x5f   :  { %426 = vst [vmem:[#allocation2 + $0x4] sm:$0xf] %v322_v5  ;;  %v428_v7 = vmul.f32 %v322_v5, %v218_v61  ;;  %v432_v8 = vmul.f32 %v322_v5, %v115_v60  ;;  %427 = vst [vmem:[#allocation2 + $0x8] sm:$0xf] %v425_v6  ;;  %v429_v0 = vmul.f32 %v425_v6, %v115_v60 }
  0x60   :  { %v431_v12 = vmul.f32 %v425_v6, %v218_v61 }
  0x61   :  { %v430_v13 = vadd.f32 %v429_v0, %v428_v7 }
  0x62   :  { %v433_v14 = vsub.f32 %v431_v12, %v432_v8 }
  0x63   :  { %434 = vst [vmem:[#allocation2 + $0xc] sm:$0xf] %v430_v13  ;;  %v436_v15 = vmul.f32 %v430_v13, %v218_v61  ;;  %v440_v11 = vmul.f32 %v430_v13, %v115_v60 }
  0x64   :  { %435 = vst [vmem:[#allocation2 + $0x10] sm:$0xf] %v433_v14  ;;  %v437_v1 = vmul.f32 %v433_v14, %v115_v60  ;;  %v439_v10 = vmul.f32 %v433_v14, %v218_v61 }
  0x66   :  { %v438_v16 = vadd.f32 %v437_v1, %v436_v15  ;;  %v441_v17 = vsub.f32 %v439_v10, %v440_v11  ;;  %v444_v20 = vld [vmem:[#allocation2] sm:$0xff] }
  0x67   :  { %448 = vxpose.xlu0.b32.start [1/4] (short) %v444_v20, 128 }
  0x68   :  { %442 = vst [vmem:[#allocation2 + $0x14] sm:$0xf] %v438_v16  ;;  %443 = vst [vmem:[#allocation2 + $0x18] sm:$0xf] %v441_v17 }
  0x6a   :  { %v445_v19 = vld [vmem:[#allocation2 + $0x8] sm:$0xff] }
  0x6b   :  { %449 = vxpose.xlu0.b32.cont [2/4] (short) %v445_v19, 128 }
  0x6f   :  { %v446_v25 = vld [vmem:[#allocation2 + $0x10] sm:$0xff]  ;;  %v447_v26 = vld [vmem:[#allocation2 + $0x18] sm:$0xff] }
  0x70   :  { %450 = vxpose.xlu0.b32.cont [3/4] (short) %v446_v25, 128 }
  0x74   :  { %451 = vxpose.xlu0.b32.end [4/4] (short) %v447_v26, 128 }
  0xe4   :  { %v464_v27 = vpop.trf.xlu0 }
  0xe5   :  { %481 = vst.msk [vmem:[%s717_s1] sm:$0xff] %vm480_vm0, %v464_v27 }
  0xe8   :  { %v465_v28 = vpop.trf.xlu0 }
  0xe9   :  { %482 = vst.msk [vmem:[%s717_s1 + $0x8] sm:$0xff] %vm480_vm0, %v465_v28 }
  0xec   :  { %v466_v18 = vpop.trf.xlu0 }
  0xed   :  { %483 = vst.msk [vmem:[%s717_s1 + $0x10] sm:$0xff] %vm480_vm0, %v466_v18 }
  0xf0   :  { %v467_v29 = vpop.trf.xlu0 }
  0xf1   :  { %484 = vst.msk [vmem:[%s717_s1 + $0x18] sm:$0xff] %vm480_vm0, %v467_v29 }
  0xf4   :  { %v468_v21 = vpop.trf.xlu0 }
  0xf5   :  { %485 = vst.msk [vmem:[%s717_s1 + $0x20] sm:$0xff] %vm480_vm0, %v468_v21 }
  0xf8   :  { %v469_v24 = vpop.trf.xlu0 }
  0xf9   :  { %486 = vst.msk [vmem:[%s717_s1 + $0x28] sm:$0xff] %vm480_vm0, %v469_v24 }
  0xfc   :  { %v470_v30 = vpop.trf.xlu0 }
  0xfd   :  { %487 = vst.msk [vmem:[%s717_s1 + $0x30] sm:$0xff] %vm480_vm0, %v470_v30 }
 0x100   :  { %v471_v22 = vpop.trf.xlu0 }
 0x101   :  { %488 = vst.msk [vmem:[%s717_s1 + $0x38] sm:$0xff] %vm480_vm0, %v471_v22 }
 0x104   :  { %v472_v31 = vpop.trf.xlu0 }
 0x105   :  { %489 = vst.msk [vmem:[%s717_s1 + $0x40] sm:$0xff] %vm480_vm0, %v472_v31 }
 0x108   :  { %v473_v32 = vpop.trf.xlu0 }
 0x109   :  { %490 = vst.msk [vmem:[%s717_s1 + $0x48] sm:$0xff] %vm480_vm0, %v473_v32 }
 0x10c   :  { %v474_v33 = vpop.trf.xlu0 }
 0x10d   :  { %491 = vst.msk [vmem:[%s717_s1 + $0x50] sm:$0xff] %vm480_vm0, %v474_v33 }
 0x110   :  { %v475_v3 = vpop.trf.xlu0 }
 0x111   :  { %492 = vst.msk [vmem:[%s717_s1 + $0x58] sm:$0xff] %vm480_vm0, %v475_v3 }
 0x114   :  { %v476_v34 = vpop.trf.xlu0 }
 0x115   :  { %493 = vst.msk [vmem:[%s717_s1 + $0x60] sm:$0xff] %vm480_vm0, %v476_v34 }
 0x118   :  { %v477_v35 = vpop.trf.xlu0 }
 0x119   :  { %494 = vst.msk [vmem:[%s717_s1 + $0x68] sm:$0xff] %vm480_vm0, %v477_v35 }
 0x11c   :  { %v478_v36 = vpop.trf.xlu0 }
 0x11d   :  { %495 = vst.msk [vmem:[%s717_s1 + $0x70] sm:$0xff] %vm480_vm0, %v478_v36 }
 0x120   :  { %v479_v37 = vpop.trf.xlu0 }
 0x121   :  { %496 = vst.msk [vmem:[%s717_s1 + $0x78] sm:$0xff] %vm480_vm0, %v479_v37 }

</bundles_post_ra>
